<compile_context>
chip_gen: v6e
topology: v6e:2x2x1
jax: 0.10.0
libtpu: 0.0.40
codegen_flags: <defaults>
</compile_context>

<pallas_src>
import functools

import jax
import jax.numpy as jnp
from jax import lax
from jax.experimental import pallas as pl
from jax.experimental.pallas import tpu as pltpu


# ----------------------------------------------------------------------------
# Kernel bodies (online / flash-style LSE over column tiles)
# ----------------------------------------------------------------------------

def _supcon_step(anchor_ref, xt_ref, out_ref, m_ref, l_ref, cnt_ref, dot_ref,
                 pos_of, *, n_valid_rows, n_valid_cols, inv_temp, loss_scale):
    """One (row_tile, col_tile) grid step of the SupCon loss.

    anchor_ref : [TM, D]  anchor features (native dtype)
    xt_ref     : [D, TN]  transposed contrast features (native dtype)
    out_ref    : [8, 128] per-row-tile partial-loss slab (written on last col)
    m/l/cnt/dot_ref : [TM, 1] f32 running max / denom / pos count / pos·logit
    pos_of(not_diag, valid_col) -> [TM, TN] f32 positive weights
    """
    tm = anchor_ref.shape[0]
    tn = xt_ref.shape[1]
    mi = pl.program_id(0)
    ni = pl.program_id(1)
    row0 = mi * tm
    col0 = ni * tn

    @pl.when(ni == 0)
    def _():
        m_ref[...] = jnp.full(m_ref.shape, -jnp.inf, jnp.float32)
        l_ref[...] = jnp.zeros(l_ref.shape, jnp.float32)
        cnt_ref[...] = jnp.zeros(cnt_ref.shape, jnp.float32)
        dot_ref[...] = jnp.zeros(dot_ref.shape, jnp.float32)

    # Fold 1/temperature into the anchor tile: O(TM*D) instead of O(TM*TN).
    a = anchor_ref[...]
    a_scaled = a * jnp.asarray(inv_temp, dtype=a.dtype)

    # Natural (M,K)x(K,N) MXU contraction -- contrast was transposed once in
    # the wrapper, so no per-step XLU transpose feeds the MXU.
    logits = jnp.dot(a_scaled, xt_ref[...],
                     preferred_element_type=jnp.float32)       # [TM, TN] f32

    g_rows = lax.broadcasted_iota(jnp.int32, (tm, tn), 0) + row0
    g_cols = lax.broadcasted_iota(jnp.int32, (tm, tn), 1) + col0
    not_diag = g_rows != g_cols            # self-contrast exclusion
    valid_col = g_cols < n_valid_cols      # padded contrast columns

    # Running max over all VALID columns (incl. diagonal), like the reference.
    logits_v = jnp.where(valid_col, logits, -jnp.inf)
    m_prev = m_ref[...]
    m_new = jnp.maximum(m_prev, jnp.max(logits_v, axis=1, keepdims=True))
    # exp over valid, non-diagonal columns (padded -> exp(-inf) = 0).
    p = jnp.where(not_diag, jnp.exp(logits_v - m_new), 0.0)
    l_ref[...] = jnp.exp(m_prev - m_new) * l_ref[...] + jnp.sum(
        p, axis=1, keepdims=True)
    m_ref[...] = m_new

    # Positive weights (fused diagonal / column-validity masking, no extra
    # [TM,TN] float mask slabs).  pos*logits is max-shift invariant, so no
    # rescaling of these accumulators is needed.
    pos = pos_of(not_diag, valid_col)                           # [TM, TN] f32
    cnt_ref[...] = cnt_ref[...] + jnp.sum(pos, axis=1, keepdims=True)
    dot_ref[...] = dot_ref[...] + jnp.sum(pos * logits, axis=1, keepdims=True)

    @pl.when(ni == pl.num_programs(1) - 1)
    def _():
        denom = l_ref[...] + 1e-8
        cnt = cnt_ref[...]
        # sum(pos * log_prob) = pos·logits - cnt*(row_max + log(denom))
        # NOTE: anchors with zero positives yield NaN, exactly like the
        # PyTorch module (no clamp), preserving original forward semantics.
        per_row = loss_scale * (
            dot_ref[...] - cnt * (m_ref[...] + jnp.log(denom))) / cnt
        # Zero padded anchor rows (they never contribute; NaN there is dropped).
        local = lax.broadcasted_iota(jnp.int32, (tm, 1), 0) + row0
        per_row = jnp.where(local < n_valid_rows, per_row, 0.0)
        tile_sum = jnp.sum(per_row)
        # Lane-dense (8,128) partial slab -> unmasked vst; value at [0,0].
        r = lax.broadcasted_iota(jnp.int32, (8, 128), 0)
        c = lax.broadcasted_iota(jnp.int32, (8, 128), 1)
        out_ref[...] = jnp.where((r == 0) & (c == 0), tile_sum, 0.0)


def _supcon_labels_kernel(anchor_ref, row_lab_ref, xt_ref, col_lab_ref,
                          out_ref, m_ref, l_ref, cnt_ref, dot_ref, *,
                          n_valid_rows, n_valid_cols, inv_temp, loss_scale):
    # Positive mask built on-chip from tiny [TM,1] / [1,TN] int32 labels: no
    # [N, N] mask is DMA'd from HBM on this path.
    def pos_of(not_diag, valid_col):
        match = row_lab_ref[...] == col_lab_ref[...]
        return jnp.where(match & not_diag & valid_col, 1.0,
                         0.0).astype(jnp.float32)

    _supcon_step(anchor_ref, xt_ref, out_ref, m_ref, l_ref, cnt_ref, dot_ref,
                 pos_of, n_valid_rows=n_valid_rows, n_valid_cols=n_valid_cols,
                 inv_temp=inv_temp, loss_scale=loss_scale)


def _supcon_mask_kernel(anchor_ref, mask_ref, xt_ref,
                        out_ref, m_ref, l_ref, cnt_ref, dot_ref, *,
                        n_valid_rows, n_valid_cols, inv_temp, loss_scale):
    def pos_of(not_diag, valid_col):
        return jnp.where(not_diag & valid_col,
                         mask_ref[...].astype(jnp.float32), 0.0)

    _supcon_step(anchor_ref, xt_ref, out_ref, m_ref, l_ref, cnt_ref, dot_ref,
                 pos_of, n_valid_rows=n_valid_rows, n_valid_cols=n_valid_cols,
                 inv_temp=inv_temp, loss_scale=loss_scale)


# ----------------------------------------------------------------------------
# Device-aware tiling / VMEM budgeting
# ----------------------------------------------------------------------------

def _round_up(x, m):
    return ((x + m - 1) // m) * m


def _vmem_capacity_bytes():
    try:
        return int(pltpu.get_tpu_info().vmem_capacity_bytes)
    except Exception:
        return 64 * 2 ** 20   # conservative fallback (v7x per-TC capacity)


def _prefers_small_tm():
    # v5e's MXU is 4x128^2, so M=128 already fills the array; v6e/v7x prefer 256.
    try:
        kind = jax.devices()[0].device_kind.lower()
    except Exception:
        return False
    return ("v5 lite" in kind) or ("v5e" in kind) or ("v5lite" in kind)


def _est_vmem_bytes(tm, tn, dim, fbytes, mask_path):
    est = 2 * tm * dim * fbytes          # anchor tile, double-buffered
    est += 2 * dim * tn * fbytes         # transposed contrast tile, double-buffered
    est += 2 * 8 * 128 * 4               # partial-output slab
    est += 4 * tm * 128 * 4              # 4 [TM,1] f32 accumulators (lane-padded)
    if mask_path:
        est += 2 * tm * tn * 2           # bf16 mask tile, double-buffered
    else:
        est += 2 * tm * 128 * 4          # [TM,1] row labels (lane-padded)
        est += 2 * 8 * tn * 4            # [1,TN] col labels (sublane-padded)
    est += 6 * tm * tn * 4               # f32 logits/exp/pos intermediates
    return est


def _pick_tiles(n_anchor, n_contrast, dim, fbytes, mask_path,
                block_rows=None, block_cols=None):
    capacity = _vmem_capacity_bytes()
    budget = int(0.70 * capacity)

    tm_limit = max(8, _round_up(n_anchor, 8))
    tn_limit = max(128, _round_up(n_contrast, 128))

    tm_fixed = block_rows is not None
    tn_fixed = block_cols is not None

    if tm_fixed:
        tm = min(max(8, _round_up(int(block_rows), 8)), tm_limit)
    else:
        tm = min(128 if _prefers_small_tm() else 256, tm_limit)
    if tn_fixed:
        tn = min(max(128, _round_up(int(block_cols), 128)), tn_limit)
    else:
        tn = min(1024, tn_limit)

    # Shrink auto-chosen dims until the per-step footprint fits the budget.
    while _est_vmem_bytes(tm, tn, dim, fbytes, mask_path) > budget:
        can_tm = (not tm_fixed) and tm > 8
        can_tn = (not tn_fixed) and tn > 128
        if not (can_tm or can_tn):
            break
        if can_tn and (tn >= tm or not can_tm):
            tn = max(128, ((tn // 2) // 128) * 128)
        else:
            tm = max(8, ((tm // 2) // 8) * 8)

    est = _est_vmem_bytes(tm, tn, dim, fbytes, mask_path)
    vmem_limit = int(min(max(2 * est, 32 * 2 ** 20), int(0.9 * capacity)))
    return tm, tn, vmem_limit


def _pad_rows(arr, n_rows, fill=0):
    pad = n_rows - arr.shape[0]
    if pad == 0:
        return arr
    return jnp.pad(arr, ((0, pad),) + ((0, 0),) * (arr.ndim - 1),
                   constant_values=fill)


# ----------------------------------------------------------------------------
# Wrapper
# ----------------------------------------------------------------------------

def supcon_loss(features, labels=None, mask=None, temperature=0.07,
                contrast_mode="all", base_temperature=0.07,
                block_rows=None, block_cols=None):
    """JAX/Pallas equivalent of SupConLoss.forward.

    features: [bsz, n_views, ...]   (bf16 or f32; stays in its dtype on the MXU)
    labels:   optional [bsz] int labels
    mask:     optional [bsz, bsz] float mask (possibly asymmetric)
    """
    if features.ndim < 3:
        raise ValueError("`features` needs to be [bsz, n_views, ...]")
    if features.ndim > 3:
        features = features.reshape(features.shape[0], features.shape[1], -1)
    if labels is not None and mask is not None:
        raise ValueError("Cannot define both `labels` and `mask`")

    bsz, n_views, dim = features.shape
    contrast_count = n_views
    # torch.cat(torch.unbind(features, dim=1), dim=0) -> view-major [N, D]
    contrast_feature = jnp.transpose(features, (1, 0, 2)).reshape(
        n_views * bsz, dim)

    if contrast_mode == "one":
        anchor_feature = features[:, 0]
        anchor_count = 1
    elif contrast_mode == "all":
        anchor_feature = contrast_feature
        anchor_count = contrast_count
    else:
        raise ValueError(f"Unknown mode: {contrast_mode}")

    n_anchor = anchor_count * bsz
    n_contrast = contrast_count * bsz
    mask_path = mask is not None

    fbytes = jnp.dtype(features.dtype).itemsize
    tm, tn, vmem_limit = _pick_tiles(n_anchor, n_contrast, dim, fbytes,
                                     mask_path, block_rows, block_cols)

    n_anchor_pad = _round_up(n_anchor, tm)
    n_contrast_pad = _round_up(n_contrast, tn)
    grid_m = n_anchor_pad // tm
    grid_n = n_contrast_pad // tn

    anchors_p = _pad_rows(anchor_feature, n_anchor_pad)
    # One-time XLA transpose + lane-dense column padding of the contrast set:
    # the kernel then does the natural (M,K)x(K,N) MXU contraction.
    xt = jnp.pad(contrast_feature.T,
                 ((0, 0), (0, n_contrast_pad - n_contrast)))

    inv_temp = 1.0 / float(temperature)
    loss_scale = -(float(temperature) / float(base_temperature))

    out_shape = jax.ShapeDtypeStruct((grid_m * 8, 128), jnp.float32)
    out_spec = pl.BlockSpec((8, 128), lambda m, n: (m, 0))
    anchor_spec = pl.BlockSpec((tm, dim), lambda m, n: (m, 0))
    xt_spec = pl.BlockSpec((dim, tn), lambda m, n: (0, n))
    scratch = [pltpu.VMEM((tm, 1), jnp.float32) for _ in range(4)]

    compiler_params = pltpu.CompilerParams(
        # row tiles are independent (shards across the 2 TCs on v7x);
        # column axis is the online-LSE reduction -> arbitrary.
        dimension_semantics=("parallel", "arbitrary"),
        vmem_limit_bytes=vmem_limit)

    common = dict(n_valid_rows=n_anchor, n_valid_cols=n_contrast,
                  inv_temp=inv_temp, loss_scale=loss_scale)

    if not mask_path:
        # labels path, or the SimCLR default (eye mask == same sample index).
        if labels is None:
            base_labels = jnp.arange(bsz, dtype=jnp.int32)
        else:
            base_labels = jnp.asarray(labels).reshape(-1).astype(jnp.int32)
            if base_labels.shape[0] != bsz:
                raise ValueError("Num of labels does not match num of features")
        row_labels = jnp.tile(base_labels, anchor_count).reshape(-1, 1)
        # fill=-1 for padded anchor rows: benign even if a real label is -1,
        # because padded rows are zeroed by the valid-row check in the kernel.
        row_labels = _pad_rows(row_labels, n_anchor_pad, fill=-1)
        col_labels = jnp.tile(base_labels, contrast_count)
        col_labels = jnp.pad(col_labels, (0, n_contrast_pad - n_contrast),
                             constant_values=-2).reshape(1, -1)

        kernel = functools.partial(_supcon_labels_kernel, **common)
        partials = pl.pallas_call(
            kernel,
            out_shape=out_shape,
            grid_spec=pltpu.PrefetchScalarGridSpec(
                num_scalar_prefetch=0, grid=(grid_m, grid_n),
                in_specs=[anchor_spec,
                          pl.BlockSpec((tm, 1), lambda m, n: (m, 0)),
                          xt_spec,
                          pl.BlockSpec((1, tn), lambda m, n: (0, n))],
                out_specs=out_spec,
                scratch_shapes=scratch),
            compiler_params=compiler_params,
        )(anchors_p, row_labels, xt, col_labels)
    else:
        # Explicit (possibly asymmetric) mask: stream [TM, TN] tiles of the
        # tiled mask in bf16 (exact for 0/1 masks), cast to f32 in-kernel.
        mask = jnp.asarray(mask)
        full_mask = jnp.tile(mask.astype(jnp.bfloat16),
                             (anchor_count, contrast_count))
        full_mask = jnp.pad(full_mask,
                            ((0, n_anchor_pad - n_anchor),
                             (0, n_contrast_pad - n_contrast)))
        kernel = functools.partial(_supcon_mask_kernel, **common)
        partials = pl.pallas_call(
            kernel,
            out_shape=out_shape,
            grid_spec=pltpu.PrefetchScalarGridSpec(
                num_scalar_prefetch=0, grid=(grid_m, grid_n),
                in_specs=[anchor_spec,
                          pl.BlockSpec((tm, tn), lambda m, n: (m, n)),
                          xt_spec],
                out_specs=out_spec,
                scratch_shapes=scratch),
            compiler_params=compiler_params,
        )(anchors_p, full_mask, xt)

    # loss.view(anchor_count, batch_size).mean() == mean over all anchors
    return jnp.sum(partials) / n_anchor


# ----------------------------------------------------------------------------
# Pure-JAX reference (mirrors the PyTorch module) for correctness checking
# ----------------------------------------------------------------------------

def _supcon_loss_ref(features, labels=None, mask=None, temperature=0.07,
                     contrast_mode="all", base_temperature=0.07):
    if features.ndim > 3:
        features = features.reshape(features.shape[0], features.shape[1], -1)
    bsz, n_views, dim = features.shape
    if labels is None and mask is None:
        mask = jnp.eye(bsz, dtype=jnp.float32)
    elif labels is not None:
        labels = labels.reshape(-1, 1)
        mask = (labels == labels.T).astype(jnp.float32)
    else:
        mask = mask.astype(jnp.float32)
    contrast_count = n_views
    contrast_feature = jnp.transpose(features, (1, 0, 2)).reshape(
        n_views * bsz, dim)
    if contrast_mode == "one":
        anchor_feature = features[:, 0]
        anchor_count = 1
    else:
        anchor_feature = contrast_feature
        anchor_count = contrast_count
    logits = (anchor_feature @ contrast_feature.T) / temperature
    logits = logits - jnp.max(logits, axis=1, keepdims=True)
    n_a = anchor_count * bsz
    mask = jnp.tile(mask, (anchor_count, contrast_count))
    logits_mask = jnp.ones((n_a, contrast_count * bsz), jnp.float32)
    logits_mask = logits_mask.at[jnp.arange(n_a), jnp.arange(n_a)].set(0.0)
    mask = mask * logits_mask
    exp_logits = jnp.exp(logits) * logits_mask
    log_prob = logits - jnp.log(exp_logits.sum(1, keepdims=True) + 1e-8)
    mean_log_prob_pos = (mask * log_prob).sum(1) / mask.sum(1)
    loss = -(temperature / base_temperature) * mean_log_prob_pos
    return loss.reshape(anchor_count, bsz).mean()


# ----------------------------------------------------------------------------

if __name__ == "__main__":
    key = jax.random.PRNGKey(0)
    k_feat, k_lab, k_feat2, k_lab2 = jax.random.split(key, 4)

    bsz, n_views, dim = 6, 2, 32
    feats = jax.random.normal(k_feat, (bsz, n_views, dim), dtype=jnp.float32)
    # L2-normalize along feature dim (standard SupCon usage)
    feats = feats / jnp.linalg.norm(feats, axis=-1, keepdims=True)
    labels = jax.random.randint(k_lab, (bsz,), 0, 3)

    # 1) supervised labels path, block_rows=8 -> 2 row tiles + row padding
    out1 = jax.block_until_ready(supcon_loss(feats, labels=labels, block_rows=8))
    ref1 = _supcon_loss_ref(feats, labels=labels)
    assert jnp.allclose(out1, ref1, rtol=1e-5, atol=2e-5), (out1, ref1)

    # 2) SimCLR default path (labels=None, mask=None)
    out2 = jax.block_until_ready(supcon_loss(feats))
    ref2 = _supcon_loss_ref(feats)
    assert jnp.allclose(out2, ref2, rtol=1e-5, atol=2e-5), (out2, ref2)

    # 3) explicit-mask path (bf16 mask tiles)
    m = (labels.reshape(-1, 1) == labels.reshape(1, -1)).astype(jnp.float32)
    out3 = jax.block_until_ready(supcon_loss(feats, mask=m, block_rows=8))
    ref3 = _supcon_loss_ref(feats, mask=m)
    assert jnp.allclose(out3, ref3, rtol=1e-5, atol=2e-5), (out3, ref3)

    # 4) contrast_mode='one'
    out4 = jax.block_until_ready(
        supcon_loss(feats, labels=labels, contrast_mode="one"))
    ref4 = _supcon_loss_ref(feats, labels=labels, contrast_mode="one")
    assert jnp.allclose(out4, ref4, rtol=1e-5, atol=2e-5), (out4, ref4)

    # 5) multiple row AND column tiles: exercises the online (flash-style) LSE
    #    across column tiles plus row/column padding.
    bsz2, dim2 = 70, 32
    feats2 = jax.random.normal(k_feat2, (bsz2, n_views, dim2), dtype=jnp.float32)
    feats2 = feats2 / jnp.linalg.norm(feats2, axis=-1, keepdims=True)
    labels2 = jax.random.randint(k_lab2, (bsz2,), 0, 5)
    out5 = jax.block_until_ready(
        supcon_loss(feats2, labels=labels2, block_rows=64, block_cols=128))
    ref5 = _supcon_loss_ref(feats2, labels=labels2)
    assert jnp.allclose(out5, ref5, rtol=1e-4, atol=1e-4), (out5, ref5)

    print("KERNEL_OK")
</pallas_src>

<mosaic_0001>
module attributes {stable_mosaic.version = 11 : i64} {
  func.func @_supcon_labels_kernel(%arg0: i32, %arg1: i32, %arg2: memref<8x32xf32, #tpu.memory_space<vmem>>, %arg3: memref<8x1xi32, #tpu.memory_space<vmem>>, %arg4: memref<32x128xf32, #tpu.memory_space<vmem>>, %arg5: memref<1x128xi32, #tpu.memory_space<vmem>>, %arg6: memref<8x128xf32, #tpu.memory_space<vmem>>, %arg7: memref<8x1xf32, #tpu.memory_space<vmem>>, %arg8: memref<8x1xf32, #tpu.memory_space<vmem>>, %arg9: memref<8x1xf32, #tpu.memory_space<vmem>>, %arg10: memref<8x1xf32, #tpu.memory_space<vmem>>) attributes {dimension_semantics = [#tpu.dimension_semantics<parallel>, #tpu.dimension_semantics<arbitrary>], iteration_bounds = array<i64: 2, 1>, scalar_prefetch = 0 : i64, scratch_operands = 4 : i64, tpu.core_type = #tpu.core_type<tc>, window_params = [{transform_indices = @transform_0, window_bounds = array<i64: 8, 32>}, {transform_indices = @transform_1, window_bounds = array<i64: 8, 1>}, {transform_indices = @transform_2, window_bounds = array<i64: 32, 128>}, {transform_indices = @transform_3, window_bounds = array<i64: 1, 128>}, {transform_indices = @transform_4, window_bounds = array<i64: 8, 128>}]} {
    %c8_i32 = arith.constant 8 : i32
    %0 = arith.muli %arg0, %c8_i32 : i32
    %c128_i32 = arith.constant 128 : i32
    %1 = arith.muli %arg1, %c128_i32 : i32
    %c0_i32 = arith.constant 0 : i32
    %2 = arith.cmpi eq, %arg1, %c0_i32 : i32
    %3 = arith.extui %2 : i1 to i32
    %c0_i32_0 = arith.constant 0 : i32
    %4 = arith.cmpi ne, %3, %c0_i32_0 : i32
    scf.if %4 {
      %cst_35 = arith.constant 0xFF800000 : f32
      %63 = vector.broadcast %cst_35 : f32 to vector<8x1xf32>
      %c0_36 = arith.constant 0 : index
      %c0_37 = arith.constant 0 : index
      %64 = vector.load %arg7[%c0_36, %c0_37] : memref<8x1xf32, #tpu.memory_space<vmem>>, vector<8x1xf32>
      tpu.vector_store %arg7[%c0_36, %c0_37], %63 {strides = array<i32>} : memref<8x1xf32, #tpu.memory_space<vmem>>, vector<8x1xf32>,
      %cst_38 = arith.constant 0.000000e+00 : f32
      %65 = vector.broadcast %cst_38 : f32 to vector<8x1xf32>
      %c0_39 = arith.constant 0 : index
      %c0_40 = arith.constant 0 : index
      %66 = vector.load %arg8[%c0_39, %c0_40] : memref<8x1xf32, #tpu.memory_space<vmem>>, vector<8x1xf32>
      tpu.vector_store %arg8[%c0_39, %c0_40], %65 {strides = array<i32>} : memref<8x1xf32, #tpu.memory_space<vmem>>, vector<8x1xf32>,
      %cst_41 = arith.constant 0.000000e+00 : f32
      %67 = vector.broadcast %cst_41 : f32 to vector<8x1xf32>
      %c0_42 = arith.constant 0 : index
      %c0_43 = arith.constant 0 : index
      %68 = vector.load %arg9[%c0_42, %c0_43] : memref<8x1xf32, #tpu.memory_space<vmem>>, vector<8x1xf32>
      tpu.vector_store %arg9[%c0_42, %c0_43], %67 {strides = array<i32>} : memref<8x1xf32, #tpu.memory_space<vmem>>, vector<8x1xf32>,
      %cst_44 = arith.constant 0.000000e+00 : f32
      %69 = vector.broadcast %cst_44 : f32 to vector<8x1xf32>
      %c0_45 = arith.constant 0 : index
      %c0_46 = arith.constant 0 : index
      %70 = vector.load %arg10[%c0_45, %c0_46] : memref<8x1xf32, #tpu.memory_space<vmem>>, vector<8x1xf32>
      tpu.vector_store %arg10[%c0_45, %c0_46], %69 {strides = array<i32>} : memref<8x1xf32, #tpu.memory_space<vmem>>, vector<8x1xf32>,
    } else {
    }
    %c0 = arith.constant 0 : index
    %c0_1 = arith.constant 0 : index
    %5 = vector.load %arg2[%c0, %c0_1] : memref<8x32xf32, #tpu.memory_space<vmem>>, vector<8x32xf32>
    %cst = arith.constant 14.2857141 : f32
    %6 = vector.broadcast %cst : f32 to vector<8x32xf32>
    %7 = arith.mulf %5, %6 : vector<8x32xf32>
    %c0_2 = arith.constant 0 : index
    %c0_3 = arith.constant 0 : index
    %8 = vector.load %arg4[%c0_2, %c0_3] : memref<32x128xf32, #tpu.memory_space<vmem>>, vector<32x128xf32>
    %cst_4 = arith.constant dense<0.000000e+00> : vector<8x128xf32>
    %9 = tpu.matmul %7, %8, %cst_4 {dimension_numbers = #tpu.dot_dimension_numbers<[1], [0], [0], [1], [0, 0, 1, 1], [], []>} : vector<8x32xf32>, vector<32x128xf32>, vector<8x128xf32> -> vector<8x128xf32>
    %10 = tpu.iota {dimensions = array<i32: 0>} : vector<8x128xi32>
    %11 = vector.broadcast %0 : i32 to vector<8x128xi32>
    %12 = arith.addi %10, %11 : vector<8x128xi32>
    %13 = tpu.iota {dimensions = array<i32: 1>} : vector<8x128xi32>
    %14 = vector.broadcast %1 : i32 to vector<8x128xi32>
    %15 = arith.addi %13, %14 : vector<8x128xi32>
    %16 = arith.cmpi ne, %12, %15 : vector<8x128xi32>
    %c12_i32 = arith.constant 12 : i32
    %17 = vector.broadcast %c12_i32 : i32 to vector<8x128xi32>
    %18 = arith.cmpi slt, %15, %17 : vector<8x128xi32>
    %cst_5 = arith.constant 0xFF800000 : f32
    %19 = vector.broadcast %cst_5 : f32 to vector<8x128xf32>
    %20 = arith.select %18, %9, %19 : vector<8x128xi1>, vector<8x128xf32>
    %c0_6 = arith.constant 0 : index
    %c0_7 = arith.constant 0 : index
    %21 = vector.load %arg7[%c0_6, %c0_7] : memref<8x1xf32, #tpu.memory_space<vmem>>, vector<8x1xf32>
    %cst_8 = arith.constant dense<0xFF800000> : vector<8xf32>
    %22 = vector.multi_reduction <maximumf>, %20, %cst_8 [1] : vector<8x128xf32> to vector<8xf32>
    %23 = vector.shape_cast %22 : vector<8xf32> to vector<8x1xf32>
    %24 = arith.maximumf %21, %23 : vector<8x1xf32>
    %25 = vector.broadcast %24 : vector<8x1xf32> to vector<8x128xf32>
    %26 = arith.subf %20, %25 : vector<8x128xf32>
    %27 = math.exp %26 : vector<8x128xf32>
    %cst_9 = arith.constant 0.000000e+00 : f32
    %28 = vector.broadcast %cst_9 : f32 to vector<8x128xf32>
    %29 = arith.select %16, %27, %28 : vector<8x128xi1>, vector<8x128xf32>
    %30 = arith.subf %21, %24 : vector<8x1xf32>
    %31 = math.exp %30 : vector<8x1xf32>
    %c0_10 = arith.constant 0 : index
    %c0_11 = arith.constant 0 : index
    %32 = vector.load %arg8[%c0_10, %c0_11] : memref<8x1xf32, #tpu.memory_space<vmem>>, vector<8x1xf32>
    %33 = arith.mulf %31, %32 : vector<8x1xf32>
    %cst_12 = arith.constant dense<0.000000e+00> : vector<8xf32>
    %34 = vector.multi_reduction <add>, %29, %cst_12 [1] : vector<8x128xf32> to vector<8xf32>
    %35 = vector.shape_cast %34 : vector<8xf32> to vector<8x1xf32>
    %36 = arith.addf %33, %35 : vector<8x1xf32>
    %c0_13 = arith.constant 0 : index
    %c0_14 = arith.constant 0 : index
    %37 = vector.load %arg8[%c0_13, %c0_14] : memref<8x1xf32, #tpu.memory_space<vmem>>, vector<8x1xf32>
    tpu.vector_store %arg8[%c0_13, %c0_14], %36 {strides = array<i32>} : memref<8x1xf32, #tpu.memory_space<vmem>>, vector<8x1xf32>,
    %c0_15 = arith.constant 0 : index
    %c0_16 = arith.constant 0 : index
    %38 = vector.load %arg7[%c0_15, %c0_16] : memref<8x1xf32, #tpu.memory_space<vmem>>, vector<8x1xf32>
    tpu.vector_store %arg7[%c0_15, %c0_16], %24 {strides = array<i32>} : memref<8x1xf32, #tpu.memory_space<vmem>>, vector<8x1xf32>,
    %c0_17 = arith.constant 0 : index
    %c0_18 = arith.constant 0 : index
    %39 = vector.load %arg3[%c0_17, %c0_18] : memref<8x1xi32, #tpu.memory_space<vmem>>, vector<8x1xi32>
    %c0_19 = arith.constant 0 : index
    %c0_20 = arith.constant 0 : index
    %40 = vector.load %arg5[%c0_19, %c0_20] : memref<1x128xi32, #tpu.memory_space<vmem>>, vector<1x128xi32>
    %41 = vector.broadcast %39 : vector<8x1xi32> to vector<8x128xi32>
    %42 = vector.broadcast %40 : vector<1x128xi32> to vector<8x128xi32>
    %43 = arith.cmpi eq, %41, %42 : vector<8x128xi32>
    %44 = arith.andi %43, %16 : vector<8x128xi1>
    %45 = arith.andi %44, %18 : vector<8x128xi1>
    %cst_21 = arith.constant 1.000000e+00 : f32
    %cst_22 = arith.constant 0.000000e+00 : f32
    %46 = vector.broadcast %cst_21 : f32 to vector<8x128xf32>
    %47 = vector.broadcast %cst_22 : f32 to vector<8x128xf32>
    %48 = arith.select %45, %46, %47 : vector<8x128xi1>, vector<8x128xf32>
    %c0_23 = arith.constant 0 : index
    %c0_24 = arith.constant 0 : index
    %49 = vector.load %arg9[%c0_23, %c0_24] : memref<8x1xf32, #tpu.memory_space<vmem>>, vector<8x1xf32>
    %cst_25 = arith.constant dense<0.000000e+00> : vector<8xf32>
    %50 = vector.multi_reduction <add>, %48, %cst_25 [1] : vector<8x128xf32> to vector<8xf32>
    %51 = vector.shape_cast %50 : vector<8xf32> to vector<8x1xf32>
    %52 = arith.addf %49, %51 : vector<8x1xf32>
    %c0_26 = arith.constant 0 : index
    %c0_27 = arith.constant 0 : index
    %53 = vector.load %arg9[%c0_26, %c0_27] : memref<8x1xf32, #tpu.memory_space<vmem>>, vector<8x1xf32>
    tpu.vector_store %arg9[%c0_26, %c0_27], %52 {strides = array<i32>} : memref<8x1xf32, #tpu.memory_space<vmem>>, vector<8x1xf32>,
    %c0_28 = arith.constant 0 : index
    %c0_29 = arith.constant 0 : index
    %54 = vector.load %arg10[%c0_28, %c0_29] : memref<8x1xf32, #tpu.memory_space<vmem>>, vector<8x1xf32>
    %55 = arith.mulf %48, %9 : vector<8x128xf32>
    %cst_30 = arith.constant dense<0.000000e+00> : vector<8xf32>
    %56 = vector.multi_reduction <add>, %55, %cst_30 [1] : vector<8x128xf32> to vector<8xf32>
    %57 = vector.shape_cast %56 : vector<8xf32> to vector<8x1xf32>
    %58 = arith.addf %54, %57 : vector<8x1xf32>
    %c0_31 = arith.constant 0 : index
    %c0_32 = arith.constant 0 : index
    %59 = vector.load %arg10[%c0_31, %c0_32] : memref<8x1xf32, #tpu.memory_space<vmem>>, vector<8x1xf32>
    tpu.vector_store %arg10[%c0_31, %c0_32], %58 {strides = array<i32>} : memref<8x1xf32, #tpu.memory_space<vmem>>, vector<8x1xf32>,
    %c0_i32_33 = arith.constant 0 : i32
    %60 = arith.cmpi eq, %arg1, %c0_i32_33 : i32
    %61 = arith.extui %60 : i1 to i32
    %c0_i32_34 = arith.constant 0 : i32
    %62 = arith.cmpi ne, %61, %c0_i32_34 : i32
    scf.if %62 {
      %c0_35 = arith.constant 0 : index
      %c0_36 = arith.constant 0 : index
      %63 = vector.load %arg8[%c0_35, %c0_36] : memref<8x1xf32, #tpu.memory_space<vmem>>, vector<8x1xf32>
      %cst_37 = arith.constant 9.99999993E-9 : f32
      %64 = vector.broadcast %cst_37 : f32 to vector<8x1xf32>
      %65 = arith.addf %63, %64 : vector<8x1xf32>
      %c0_38 = arith.constant 0 : index
      %c0_39 = arith.constant 0 : index
      %66 = vector.load %arg9[%c0_38, %c0_39] : memref<8x1xf32, #tpu.memory_space<vmem>>, vector<8x1xf32>
      %c0_40 = arith.constant 0 : index
      %c0_41 = arith.constant 0 : index
      %67 = vector.load %arg10[%c0_40, %c0_41] : memref<8x1xf32, #tpu.memory_space<vmem>>, vector<8x1xf32>
      %c0_42 = arith.constant 0 : index
      %c0_43 = arith.constant 0 : index
      %68 = vector.load %arg7[%c0_42, %c0_43] : memref<8x1xf32, #tpu.memory_space<vmem>>, vector<8x1xf32>
      %69 = math.log %65 : vector<8x1xf32>
      %70 = arith.addf %68, %69 : vector<8x1xf32>
      %71 = arith.mulf %66, %70 : vector<8x1xf32>
      %72 = arith.subf %67, %71 : vector<8x1xf32>
      %cst_44 = arith.constant -1.000000e+00 : f32
      %73 = vector.broadcast %cst_44 : f32 to vector<8x1xf32>
      %74 = arith.mulf %73, %72 : vector<8x1xf32>
      %75 = arith.divf %74, %66 : vector<8x1xf32>
      %76 = tpu.iota {dimensions = array<i32: 0>} : vector<8x1xi32>
      %77 = vector.broadcast %0 : i32 to vector<8x1xi32>
      %78 = arith.addi %76, %77 : vector<8x1xi32>
      %c12_i32_45 = arith.constant 12 : i32
      %79 = vector.broadcast %c12_i32_45 : i32 to vector<8x1xi32>
      %80 = arith.cmpi slt, %78, %79 : vector<8x1xi32>
      %cst_46 = arith.constant 0.000000e+00 : f32
      %81 = vector.broadcast %cst_46 : f32 to vector<8x1xf32>
      %82 = arith.select %80, %75, %81 : vector<8x1xi1>, vector<8x1xf32>
      %83 = vector.shape_cast %82 : vector<8x1xf32> to vector<1x8x1xf32>
      %cst_47 = arith.constant dense<0.000000e+00> : vector<1xf32>
      %84 = vector.multi_reduction <add>, %83, %cst_47 [1, 2] : vector<1x8x1xf32> to vector<1xf32>
      %85 = vector.shape_cast %84 : vector<1xf32> to vector<1x1x1xf32>
      %86 = vector.extract %85[0, 0, 0] : f32 from vector<1x1x1xf32>
      %87 = tpu.iota {dimensions = array<i32: 0>} : vector<8x128xi32>
      %88 = tpu.iota {dimensions = array<i32: 1>} : vector<8x128xi32>
      %c0_i32_48 = arith.constant 0 : i32
      %89 = vector.broadcast %c0_i32_48 : i32 to vector<8x128xi32>
      %90 = arith.cmpi eq, %87, %89 : vector<8x128xi32>
      %c0_i32_49 = arith.constant 0 : i32
      %91 = vector.broadcast %c0_i32_49 : i32 to vector<8x128xi32>
      %92 = arith.cmpi eq, %88, %91 : vector<8x128xi32>
      %93 = arith.andi %90, %92 : vector<8x128xi1>
      %cst_50 = arith.constant 0.000000e+00 : f32
      %94 = vector.broadcast %86 : f32 to vector<8x128xf32>
      %95 = vector.broadcast %cst_50 : f32 to vector<8x128xf32>
      %96 = arith.select %93, %94, %95 : vector<8x128xi1>, vector<8x128xf32>
      %c0_51 = arith.constant 0 : index
      %c0_52 = arith.constant 0 : index
      %97 = vector.load %arg6[%c0_51, %c0_52] : memref<8x128xf32, #tpu.memory_space<vmem>>, vector<8x128xf32>
      tpu.vector_store %arg6[%c0_51, %c0_52], %96 {strides = array<i32>} : memref<8x128xf32, #tpu.memory_space<vmem>>, vector<8x128xf32>,
    } else {
    }
    return
  }
  func.func @transform_0(%arg0: i32, %arg1: i32) -> (i32, i32) {
    %c0_i32 = arith.constant 0 : i32
    %c0_i32_0 = arith.constant 0 : i32
    return %arg0, %c0_i32 : i32, i32
  }
  func.func @transform_1(%arg0: i32, %arg1: i32) -> (i32, i32) {
    %c0_i32 = arith.constant 0 : i32
    %c0_i32_0 = arith.constant 0 : i32
    return %arg0, %c0_i32 : i32, i32
  }
  func.func @transform_2(%arg0: i32, %arg1: i32) -> (i32, i32) {
    %c0_i32 = arith.constant 0 : i32
    %c0_i32_0 = arith.constant 0 : i32
    return %c0_i32, %arg1 : i32, i32
  }
  func.func @transform_3(%arg0: i32, %arg1: i32) -> (i32, i32) {
    %c0_i32 = arith.constant 0 : i32
    %c0_i32_0 = arith.constant 0 : i32
    return %c0_i32, %arg1 : i32, i32
  }
  func.func @transform_4(%arg0: i32, %arg1: i32) -> (i32, i32) {
    %c0_i32 = arith.constant 0 : i32
    %c0_i32_0 = arith.constant 0 : i32
    return %arg0, %c0_i32 : i32, i32
  }
}

</mosaic_0001>

<bundles_post_ra>
// kernel: tpu_custom_call.1
= control target key start
LH: loop header
LB: loop body
LE: loop exit
PB: predicated region body
PF: predicated region fallthrough
CT: control target
= control target key end

     0   :  { %9 = vsyncpa [#allocation7], 0  ;;  %s984_s0 = inlined_call_operand.vmem [shape: f32[16,32], index: 0, kind: input, shape index: {}]   ;;  %s985_s1 = inlined_call_operand.vmem [shape: s32[16,1], index: 1, kind: input, shape index: {}]   ;;  %s986_s2 = inlined_call_operand.hbm [shape: f32[32,128], index: 2, kind: input, shape index: {}]   ;;  %s987_s3 = inlined_call_operand.vmem [shape: s32[1,128], index: 3, kind: input, shape index: {}]   ;;  %s988_s4 = inlined_call_operand.hbm [shape: f32[16,128], index: 4, kind: output, shape index: {}]  }
   0x1   :  { %10 = vsyncpa [#allocation8], 0 }
   0x2   :  { %12 = vsyncpa [#allocation8 + $0x1], 0  ;;  %s820_s15 = smov 0   ;;  %s822_s16 = smov 0  }
   0x3   :  { %s824_s17 = smov 0   ;;  %s826_s18 = smov 0  }
   0x4   :  { %s828_s19 = smov 0   ;;  %s830_s20 = smov 0  }
   0x5 LB: > { %s561_s21 = sadd.s32 4294967295, %s785_s20   ;;  %s562_s22 = sadd.s32 4294967294, %s785_s20   ;;  %s785_s20 = sphi %s830_s20, %s18_s20   ;;  %s781_s19 = sphi %s828_s19, %s997_s19   ;;  %s777_s18 = sphi %s826_s18, %s996_s18   ;;  %s773_s17 = sphi %s824_s17, %s995_s17   ;;  %s769_s16 = sphi %s822_s16, %s994_s16   ;;  %s765_s15 = sphi %s820_s15, %s993_s15  }
   0x6   : > { %s30_s23 = sadd.s32 1, %s781_s19  ;;  %s141_s24 = sadd.s32 1, %s773_s17 }
   0x7   : > { %p32_p0 = scmp.ge.s32.totalorder %s30_s23, 2  ;;  %p151_p1 = scmp.ne.s32.totalorder %s773_s17, %s769_s16 }
   0x8   : > { %p152_p2 = scmp.eq.s32.totalorder %s561_s21, 1  ;;  %p157_p3 = scmp.ne.s32.totalorder %s769_s16, %s765_s15 }
   0x9   : > { %s999_s23 = smov (%p32_p0, %s30_s23), 0  ;;  %p158_p5 = scmp.eq.s32.totalorder %s562_s22, 1 }
   0xa   : > { %p860_p4 = por %p152_p2, %p151_p1  ;;  %s138_s26 = ssub.s32 %s781_s19, %s999_s23 }
   0xb   : > { %p563_p6 = scmp.ge.s32.totalorder %s785_s20, 1  ;;  %p139_p7 = scmp.eq.s32.totalorder %s138_s26, 0 }
   0xc   : > { %p867_p8 = por %p158_p5, %p157_p3  ;;  %p165_p9 = scmp.lt.s32.totalorder %s785_s20, 3 }
   0xd   : > { %s873_s28 = scalar_select %p139_p7, %s773_s17, %s141_s24  }
   0xe   : > { %p875_p10 = pnand %p563_p6, %p165_p9  ;;  %p879_p11 = scmp.eq.s32.totalorder %s561_s21, 0 }
   0xf   : > { %s787_s5 = smov [#allocation6]  }
  0x10   : > { %p603_p12 = pneg %p875_p10  ;;  %s179_s6 = sshll.u32 %s787_s5, 4  ;;  %s180_s6 = int_to_ptr.vmem [resolvable:$true] %s179_s6 }
  0x11   : > { %s690_s7 = scalar_lea.vmem %s180_s6, 512  ;;  %p698_p5 = scmp.lt.s32.totalorder %s180_s6, %s180_s6 }
  0x12   : > { %p604_p13 = pnand %p879_p11, %p603_p12  ;;  %p691_p1 = scmp.ne.s32.totalorder %s180_s6, %s690_s7 }
  0x13   : > { %p699_p6 = scmp.lt.s32.totalorder %s690_s7, %s690_s7 }
  0x14   : > { %p681_p0 = pneg %p604_p13 }
  0x15   : > { %p700_p7 = por %p699_p6, %p698_p5 }
  0x16   : > { %p693_p2 = pnand %p691_p1, %p681_p0 }
  0x18   : > { %p694_p3 = pneg %p693_p2 }
  0x1a   : > { %p701_p9 = pnand %p700_p7, %p694_p3 }
  0x1c   : > { %704 = shalt.err (!%p701_p9)
}
  0x1d   : > { %s788_s8 = smov 128   ;;  %s789_s9 = smov 8  }
  0x1e   : > { %606 = dma.hbm_to_vmem [thread:$0]  (!%p604_p13), %s986_s2, 512, %s180_s6, [#allocation7], %s788_s8, %s788_s8, %s789_s9  }
  0x1f   : > { %215 = sbr.rel (%p875_p10) target bundleno = 917 (0x395), region = 36 }
  0x24   : > { %756 = dma.done.wait (%p879_p11), [#allocation7], 512  }
  0x25   : > { %758 = vsyncadd (%p879_p11), [#allocation7], 4294966784  ;;  %p247_p12 = scmp.lt.s32.totalorder %s777_s18, 1  ;;  %v790_v0 = vmov 0.0   ;;  %vm791_vm0 = vmmov 0   ;;  %v792_v1 = vmov 0   ;;  %v349_v10 = vlaneseq }
  0x26   : > { %584 = vmatprep.subr.mxu0 %v790_v0  ;;  %592 = vmatprep.mubr.msk.f32.mxu0 %vm791_vm0, %v790_v0  ;;  %v274_v2 = vld [vmem:[#allocation6 + $0x18] sm:$0xff]  ;;  %v273_v3 = vld [vmem:[#allocation6 + $0x10] sm:$0xff]  ;;  %v272_v6 = vld [vmem:[#allocation6 + $0x8] sm:$0xff]  ;;  %vm275_vm1 = vcmask 261120   ;;  %vm264_vm2 = vcmask 7168   ;;  %v793_v9 = vmov -inf  }
  0x27   : > { %s248_s12 = scalar_select %p247_p12, %s777_s18, 1  ;;  %670 = vset.pattern.permute.xlu1 %v792_v1  ;;  %669 = vset.pattern.permute.xlu0 %v792_v1  ;;  %v271_v7 = vld [vmem:[#allocation6] sm:$0xff]  ;;  %265 = vst.msk [vmem:[#allocation2] sm:$0xff] %vm264_vm2, %v793_v9  ;;  %266 = vst.msk [vmem:[#allocation3] sm:$0xff] %vm264_vm2, %v790_v0  ;;  %v916_v11 = vand.u32 127, %v349_v10  ;;  %v923_v22 = vshrl.u32 %v349_v10, 7 }
  0x28   : > { %585 = vmatpush3.msra.mxu0 %v274_v2  ;;  %267 = vst.msk [vmem:[#allocation4] sm:$0xff] %vm264_vm2, %v790_v0  ;;  %268 = vst.msk [vmem:[#allocation5] sm:$0xff] %vm264_vm2, %v790_v0  ;;  %s572_s30 = sshll.u32 %s777_s18, 3  ;;  %v574_v25 = vld [vmem:[%s987_s3] ss:$0 sm:$0xff]  ;;  %s244_s7 = sand.u32 1, %s769_s16  }
  0x29   : > { %s570_s13 = sshll.u32 %s248_s12, 3  ;;  %586 = vmatprep.subr.mxu0 %v790_v0  ;;  %vm358_vm3 = vcmp.lt.s32.totalorder %v916_v11, 12  ;;  %v351_v23 = vstv %s572_s30  ;;  %s569_s8 = sshll.u32 %s244_s7, 3  ;;  %vm436_vm9 = vcmp.eq.s32.totalorder %v923_v22, 0  ;;  %vm437_vm10 = vcmp.eq.s32.totalorder %v916_v11, 0 }
  0x2a   : > { %s250_s22 = scalar_lea.vmem %s984_s0, %s570_s13  ;;  %s254_s29 = scalar_lea.vmem %s985_s1, %s570_s13  ;;  %587 = vmatpush3.msra.mxu0 %v273_v3  ;;  %v352_v24 = vadd.s32 %v351_v23, %v923_v22  ;;  %vm438_vm11 = vmand %vm436_vm9, %vm437_vm10 }
  0x2b   : > { %v269_v4 = vld [vmem:[%s250_s22] sm:$0xff]  ;;  %588 = vmatprep.subr.mxu0 %v790_v0  ;;  %s576_s9 = sshll.u32 %s777_s18, 7  ;;  %s246_s10 = scalar_lea.vmem [#allocation9], %s569_s8 }
  0x2c   : > { %v384_v5 = vld [vmem:[%s254_s29] sm:$0xff]  ;;  %v270_v8 = vmul.f32 14.285714, %v269_v4  ;;  %589 = vmatpush3.msra.mxu0 %v272_v6  ;;  %vm357_vm4 = vcmp.ne.s32.totalorder %v352_v24, %v916_v11  ;;  %vm424_vm8 = vcmp.lt.s32.totalorder %v352_v24, 12  ;;  %s456_s11 = sshll.u32 %s246_s10, 4  ;;  %s944_s21 = scalar_lea.hbm %s988_s4, %s576_s9  ;;  %s457_s11 = int_to_ptr.vmem [resolvable:$true] %s456_s11 }
  0x2d   : > { %387 = vperm.xlu1 %670, %v384_v5   ;;  %590 = vmatprep.subr.mxu0 %v790_v0  ;;  %s443_s22 = scalar_lea.sflag [#allocation8], %s244_s7  ;;  %s705_s24 = scalar_lea.vmem %s457_s11, 128 }
  0x2e   : > { %591 = vmatpush3.msra.mxu0 %v271_v7  ;;  %v360_v15 = vld [vmem:[#allocation2] sm:$0xff]  ;;  %v376_v33 = vld [vmem:[#allocation3] sm:$0xff]  ;;  %p706_p10 = scmp.ne.s32.totalorder %s457_s11, %s705_s24  ;;  %s794_s18 = smov [#allocation9]  }
  0x2f   : > { %593 = vmatmul.mubr.msk.f32.vlgmr.msra.gmra.mxu0 %vm275_vm1, %v270_v8  ;;  %v397_v37 = vld [vmem:[#allocation4] sm:$0xff]  ;;  %v402_v40 = vld [vmem:[#allocation5] sm:$0xff]  ;;  %s709_s26 = sshll.u32 %s794_s18, 4  ;;  %s710_s26 = int_to_ptr.vmem [resolvable:$false] %s709_s26 }
  0x30   : > { %p707_p11 = pnand %p706_p10, %p860_p4  ;;  %s711_s29 = scalar_lea.vmem %s710_s26, 256 }
  0x31   : > { %p712_p0 = scmp.lt.s32.totalorder %s457_s11, %s710_s26  ;;  %p713_p1 = scmp.lt.s32.totalorder %s711_s29, %s705_s24 }
  0x32   : > { %p708_p13 = pneg %p707_p11 }
  0x33   : > { %p714_p2 = por %p713_p1, %p712_p0 }
  0x35   : > { %p715_p3 = pnand %p714_p2, %p708_p13 }
  0xa8   : > { %v388_v26 = vpop.permute.xlu1 %387 }
  0xa9   : > { %vm393_vm5 = vcmp.eq.s32.totalorder %v388_v26, %v574_v25 }
  0xaa   : > { %vm394_vm6 = vmand %vm393_vm5, %vm357_vm4 }
  0xab   : > { %vm395_vm7 = vmand %vm394_vm6, %vm358_vm3 }
  0xac   : > { %v396_v29 = vsel %vm395_vm7, 1.0, %v790_v0 }
  0xef   : > { %v345_v12 = vpop.f32.mrf.mxu0 }
  0xf0   : > { %v359_v13 = vsel %vm358_vm3, %v345_v12, -inf  ;;  %v403_v30 = vmul.f32 %v396_v29, %v345_v12 }
  0xf1   : > { %361 = vmax.xlane.f32.xlu0 %v359_v13  ;;  %v594_v14 = vpop.f32.mrf.mxu0 }
 0x17a   : > { %v362_v16 = vpop.xlane.xlu0 %361 }
 0x17b   : > { %v363_v17 = vmax.f32 %v360_v15, %v362_v16 }
 0x17d   : > { %v373_v18 = vsub.f32 %v360_v15, %v363_v17  ;;  %383 = vst.msk [vmem:[#allocation2] sm:$0xff] %vm264_vm2, %v363_v17  ;;  %366 = vperm.xlu0 %669, %v363_v17  }
 0x17f   : > { %v374_v31 = vmul.f32 1.442695, %v373_v18 }
 0x184   : > { %v415_v48 = vld [vmem:[#allocation2] sm:$0xff] }
 0x1f8   : > { %v367_v19 = vpop.permute.xlu0 %366 }
 0x1f9   : > { %v369_v20 = vsub.f32 %v359_v13, %v367_v19 }
 0x1fb   : > { %v370_v21 = vmul.f32 1.442695, %v369_v20 }
 0x1fd   : > { %671 = vpow2.f32 %v370_v21 }
 0x1fe   : > { %673 = vpow2.f32 %v374_v31 }
 0x20a   : > { %v672_v27 = vpop.eup %671 }
 0x20b   : > { %v372_v28 = vsel %vm357_vm4, %v672_v27, 0.0  ;;  %v674_v32 = vpop.eup %673 }
 0x20c   : > { %378 = vadd.xlane.f32.xlu1 %v372_v28  ;;  %v377_v34 = vmul.f32 %v674_v32, %v376_v33 }
 0x210   : > { %398 = vadd.xlane.f32.xlu1 %v396_v29 }
 0x214   : > { %404 = vadd.xlane.f32.xlu1 %v403_v30 }
 0x295   : > { %v379_v35 = vpop.xlane.xlu1 %378 }
 0x296   : > { %v380_v36 = vadd.f32 %v379_v35, %v377_v34 }
 0x298   : > { %382 = vst.msk [vmem:[#allocation3] sm:$0xff] %vm264_vm2, %v380_v36 }
 0x299   : > { %v399_v38 = vpop.xlane.xlu1 %398 }
 0x29a   : > { %v400_v39 = vadd.f32 %v399_v38, %v397_v37 }
 0x29c   : > { %401 = vst.msk [vmem:[#allocation4] sm:$0xff] %vm264_vm2, %v400_v39 }
 0x29d   : > { %v405_v41 = vpop.xlane.xlu1 %404 }
 0x29e   : > { %v406_v42 = vadd.f32 %v405_v41, %v402_v40 }
 0x29f   : > { %v411_v43 = vld [vmem:[#allocation3] sm:$0xff] }
 0x2a0   : > { %407 = vst.msk [vmem:[#allocation5] sm:$0xff] %vm264_vm2, %v406_v42  ;;  %v412_v44 = vadd.f32 1e-08, %v411_v43 }
 0x2a2   : > { %675 = vlog2.f32 %v412_v44 }
 0x2a3   : > { %v413_v45 = vld [vmem:[#allocation4] sm:$0xff] }
 0x2a4   : > { %677 = vrcp.f32 %v413_v45 }
 0x2a7   : > { %v414_v51 = vld [vmem:[#allocation5] sm:$0xff] }
 0x2af   : > { %v676_v46 = vpop.eup %675 }
 0x2b0   : > { %v417_v47 = vmul.f32 0.6931472, %v676_v46 }
 0x2b1   : > { %v678_v53 = vpop.eup %677 }
 0x2b2   : > { %v418_v49 = vadd.f32 %v417_v47, %v415_v48 }
 0x2b4   : > { %v419_v50 = vmul.f32 %v418_v49, %v413_v45 }
 0x2b6   : > { %v420_v52 = vsub.f32 %v414_v51, %v419_v50 }
 0x2b8   : > { %v421_v54 = vmul.f32 -1.0, %v420_v52 }
 0x2ba   : > { %v423_v55 = vmul.f32 %v678_v53, %v421_v54 }
 0x2bc   : > { %v425_v56 = vsel %vm424_vm8, %v423_v55, 0.0 }
 0x2bd   : > { %v426_v57 = vsel %vm264_vm2, %v425_v56, 0.0 }
 0x2be   : > { %427 = vadd.xlane.f32.xlu0 %v426_v57 }
 0x347   : > { %v428_v58 = vpop.xlane.xlu0 %427 }
 0x348   : > { %v429_v59 = vrot.slane %v428_v58, 4 }
 0x34a   : > { %v430_v60 = vadd.f32 %v429_v59, %v428_v58 }
 0x34c   : > { %v431_v61 = vrot.slane %v430_v60, 2 }
 0x34e   : > { %v432_v62 = vadd.f32 %v431_v61, %v430_v60 }
 0x350   : > { %v433_v63 = vrot.slane %v432_v62, 1 }
 0x352   : > { %v434_v0 = vadd.f32 %v433_v63, %v432_v62 }
 0x354   : > { %595 = vpush %v434_v0 }
 0x385   : > { %s596_s12 = spop %595 }
 0x386   : > { %v439_v1 = vstv %s596_s12 }
 0x387   : > { %v440_v2 = vsel %vm438_vm11, %v439_v1, 0.0 }
 0x388   : > { %441 = vst [vmem:[%s246_s10] sm:$0xff] %v440_v2 }
 0x389   : > { %718 = shalt.err (!%p715_p3)
}
 0x38a   : > { %s719_s30 = scalar_lea.hbm %s944_s21, 128  ;;  %s723_s7 = scalar_lea.hbm %s988_s4, 256 }
 0x38b   : > { %p720_p5 = scmp.ne.s32.totalorder %s944_s21, %s719_s30  ;;  %p724_p9 = scmp.lt.s32.totalorder %s944_s21, %s988_s4 }
 0x38c   : > { %p725_p12 = scmp.lt.s32.totalorder %s723_s7, %s719_s30 }
 0x38d   : > { %p721_p6 = pnand %p720_p5, %p860_p4 }
 0x38e   : > { %p726_p10 = por %p725_p12, %p724_p9 }
 0x38f   : > { %p722_p7 = pneg %p721_p6 }
 0x391   : > { %p727_p11 = pnand %p726_p10, %p722_p7 }
 0x393   : > { %730 = shalt.err (!%p727_p11)
}
 0x394   : > { %601 = dma.vmem_to_hbm [thread:$0]  (%p860_p4), %s457_s11, 128, %s944_s21, %s443_s22  }
 0x395 PF: > { %p613_p13 = scmp.ge.s32.totalorder %s785_s20, 2  ;;  %s468_s10 = sand.u32 1, %s765_s15  }
 0x396   : > { %s469_s12 = scalar_lea.sflag [#allocation8], %s468_s10 }
 0x397   : > { %p608_p0 = pnand %p613_p13, %p867_p8 }
 0x399   : > { %p609_p1 = pneg %p608_p0 }
 0x39b   : > { %760 = dma.done.wait (%p609_p1), %s469_s12, 128  }
 0x39c   : > { %762 = vsyncadd (%p609_p1), %s469_s12, 4294967168  ;;  %s18_s20 = sadd.s32 1, %s785_s20   ;;  %s993_s15 = smov %s769_s16 }
 0x39d   : > { %p15_p2 = scmp.ge.s32.totalorder %s18_s20, 4   ;;  %s994_s16 = smov %s773_s17 }
 0x39e   : > { %s995_s17 = smov %s873_s28  ;;  %s996_s18 = smov %s781_s19 }
 0x39f   : > { %s997_s19 = smov %s999_s23  ;;  %17 = sbr.rel (!%p15_p2) target bundleno = 5 (0x5), region = 91 }
 0x3a4   :  { %474 = vsyncpa [#allocation7], 1 }
 0x3a5   :  { %476 = vsyncpa [#allocation7 + $0x1], 1 }
 0x3a6   :  { %477 = vsyncpa [#allocation8], 1 }
 0x3a7   :  { %479 = vsyncpa [#allocation8 + $0x1], 1 }

</bundles_post_ra>
